<compile_context>
chip_gen: v6e
topology: v6e:2x2x1
jax: 0.10.0
libtpu: 0.0.40
codegen_flags: <defaults>
</compile_context>

<pallas_src>
import numpy as np
import jax
import jax.numpy as jnp
from jax.experimental import pallas as pl
from jax.experimental.pallas import tpu as pltpu

_MiB = 1024 * 1024


def _vmem_capacity_bytes() -> int:
    """Chip VMEM capacity; conservative 64 MiB (v7x per-TC) if unqueryable."""
    try:
        info = pltpu.get_tpu_info()
        for name in ("vmem_capacity_bytes", "vmem_size_bytes", "vmem_bytes"):
            v = getattr(info, name, None)
            if v:
                return int(v)
    except Exception:
        pass
    return 64 * _MiB


def _build_linear_upsample_matrix(l_in: int, upscale_factor: int,
                                  l_out_pad: int, dtype) -> jnp.ndarray:
    """Interpolation matrix reproducing torch.nn.Upsample(mode='linear',
    scale_factor=upscale_factor, align_corners=False) exactly; columns
    [l_out, l_out_pad) are zero padding for lane-dense stores."""
    l_out = l_in * upscale_factor
    scale = 1.0 / upscale_factor
    w = np.zeros((l_in, l_out_pad), dtype=np.float32)
    for j in range(l_out):
        # PyTorch area_pixel_compute_source_index (align_corners=False, non-cubic):
        src = scale * (j + 0.5) - 0.5
        if src < 0.0:
            src = 0.0
        i0 = int(np.floor(src))
        i1 = min(i0 + 1, l_in - 1)
        lam1 = src - i0
        w[i0, j] += 1.0 - lam1
        w[i1, j] += lam1
    return jnp.asarray(w, dtype=dtype)


def _upsample_matmul_kernel(x_ref, w_ref, o_ref):
    # x_ref: (TM, L_in), w_ref: (L_in, L_out_pad) [VMEM-resident], o_ref: (TM, L_out_pad)
    o_ref[...] = jnp.dot(
        x_ref[...], w_ref[...], preferred_element_type=jnp.float32
    ).astype(o_ref.dtype)


def _choose_row_tile(nc: int, per_row_bytes: int, packing: int,
                     tile_budget_bytes: int) -> int:
    """Row-tile (sublane dim): fits the VMEM budget, multiple of the dtype's
    sublane packing, and small enough to give >= ~4 grid steps (pipelining +
    v7x megacore sharding of the 'parallel' row axis)."""
    if nc <= packing:
        return nc  # single full-extent row block (always layout-legal)
    tm_budget = tile_budget_bytes // max(per_row_bytes, 1)
    tm_steps = -(-nc // 4)            # keep >= ~4 grid steps when nc allows
    tm = min(tm_budget, tm_steps, 1024)
    tm = max(packing, (tm // packing) * packing)
    return int(tm)


def _upsample_linear_xla(x: jnp.ndarray, upscale_factor: int) -> jnp.ndarray:
    """Plain-XLA gather+lerp fallback (tiny shapes / dense-W-doesn't-fit).
    Computed in f32 so it matches the Pallas path's numerics."""
    l_in = x.shape[-1]
    l_out = l_in * upscale_factor
    j = jnp.arange(l_out, dtype=jnp.float32)
    src = jnp.maximum((j + 0.5) / upscale_factor - 0.5, 0.0)
    i0 = jnp.floor(src).astype(jnp.int32)
    i1 = jnp.minimum(i0 + 1, l_in - 1)
    lam1 = src - i0.astype(jnp.float32)
    x0 = jnp.take(x, i0, axis=-1).astype(jnp.float32)
    x1 = jnp.take(x, i1, axis=-1).astype(jnp.float32)
    return (x0 * (1.0 - lam1) + x1 * lam1).astype(x.dtype)


def _call_pallas(x2d, w, *, tm, l_in, l_out_pad, nc, vmem_limit, cost,
                 single_buffer_w):
    w_spec_kwargs = {}
    if single_buffer_w:
        # Constant index_map -> W never changes; one buffer is enough.
        w_spec_kwargs["pipeline_mode"] = pl.Buffered(1)
    return pl.pallas_call(
        _upsample_matmul_kernel,
        out_shape=jax.ShapeDtypeStruct((nc, l_out_pad), x2d.dtype),
        grid_spec=pltpu.PrefetchScalarGridSpec(
            num_scalar_prefetch=0,
            grid=(pl.cdiv(nc, tm),),
            in_specs=[
                pl.BlockSpec((tm, l_in), lambda i: (i, 0)),       # row tile, pipelined
                pl.BlockSpec((l_in, l_out_pad), lambda i: (0, 0),  # resident W
                             **w_spec_kwargs),
            ],
            out_specs=pl.BlockSpec((tm, l_out_pad), lambda i: (i, 0)),
        ),
        compiler_params=pltpu.CompilerParams(
            dimension_semantics=("parallel",),   # rows independent -> megacore shard
            vmem_limit_bytes=int(vmem_limit),
        ),
        cost_estimate=cost,
    )(x2d, w)


def upsample_linear(x: jnp.ndarray, upscale_factor: int = 2, *,
                    force_pallas: bool = False) -> jnp.ndarray:
    """x: (N, C, L) float array -> (N, C, L * upscale_factor).

    Matches torch.nn.Upsample(scale_factor=upscale_factor, mode='linear',
    align_corners=False).
    """
    assert x.ndim == 3, "expected (N, C, L) input for 1-D linear upsample"
    n, c, l_in = x.shape
    l_out = l_in * upscale_factor
    nc = n * c
    itemsize = jnp.dtype(x.dtype).itemsize

    # Tiny shapes: per-step Pallas overhead and sub-128-lane outputs dominate;
    # XLA fusion wins. Keep the kernel for real workloads (or when forced).
    tiny = (l_out < 128) or (nc * l_out * itemsize < (1 << 20))
    if tiny and not force_pallas:
        return _upsample_linear_xla(x, upscale_factor)

    # Lane-dense output stores: pad L_out up to a multiple of 128 via zero
    # columns in W; slice the padding off in the wrapper.
    l_out_pad = ((l_out + 127) // 128) * 128

    # W dtype: only downcast when the interpolation weights are exactly
    # representable (power-of-two scale factors); otherwise keep f32 weights.
    pow2_factor = upscale_factor >= 1 and (upscale_factor & (upscale_factor - 1)) == 0
    w_dtype = x.dtype if pow2_factor else jnp.float32
    w_itemsize = jnp.dtype(w_dtype).itemsize

    # Chip-aware VMEM budgeting.
    vmem_cap = _vmem_capacity_bytes()            # 128 MiB v5e/v6e, 64 MiB v7x
    usable = max(vmem_cap - 12 * _MiB, 24 * _MiB)

    w_bytes = l_in * l_out_pad * w_itemsize
    w_resident = 2 * w_bytes                     # conservative: assume 2 W buffers
    packing = max(8, 8 * (4 // max(itemsize, 1)))  # 8 f32 / 16 bf16 / 32 int8
    per_row_bytes = 2 * (l_in + l_out_pad) * itemsize  # double-buffered x + out

    if w_resident + packing * per_row_bytes + 2 * _MiB > usable:
        # TODO(synk): banded-W / K-slice streaming for very long L; dense
        # resident W no longer fits this chip's VMEM -> XLA fallback for now.
        return _upsample_linear_xla(x, upscale_factor)

    tile_budget = min(usable - w_resident - 2 * _MiB, 48 * _MiB)
    tm = _choose_row_tile(nc, per_row_bytes, packing, tile_budget)

    vmem_need = tm * per_row_bytes + w_resident + 2 * _MiB
    vmem_limit = min(max(vmem_need, 32 * _MiB), usable)

    cost = pl.CostEstimate(
        flops=2 * nc * l_in * l_out_pad,
        transcendentals=0,
        bytes_accessed=int((nc * l_in + nc * l_out_pad) * itemsize + w_bytes),
    )

    w = _build_linear_upsample_matrix(l_in, upscale_factor, l_out_pad, w_dtype)
    x2d = x.reshape(nc, l_in)

    kwargs = dict(tm=tm, l_in=l_in, l_out_pad=l_out_pad, nc=nc,
                  vmem_limit=vmem_limit, cost=cost)
    try:
        out2d = _call_pallas(x2d, w, single_buffer_w=True, **kwargs)
    except Exception:
        # pipeline_mode=pl.Buffered(1) not supported on this JAX version;
        # fall back to the default (double-buffered) W spec.
        out2d = _call_pallas(x2d, w, single_buffer_w=False, **kwargs)

    if l_out_pad != l_out:
        out2d = out2d[:, :l_out]
    return out2d.reshape(n, c, l_out)


def _reference_upsample_linear(x: np.ndarray, upscale_factor: int = 2) -> np.ndarray:
    """Pure-numpy reference matching PyTorch's linear upsample (align_corners=False)."""
    n, c, l_in = x.shape
    l_out = l_in * upscale_factor
    scale = 1.0 / upscale_factor
    out = np.empty((n, c, l_out), dtype=np.float32)
    xf = x.astype(np.float32)
    for j in range(l_out):
        src = max(scale * (j + 0.5) - 0.5, 0.0)
        i0 = int(np.floor(src))
        i1 = min(i0 + 1, l_in - 1)
        lam1 = src - i0
        out[:, :, j] = (1.0 - lam1) * xf[:, :, i0] + lam1 * xf[:, :, i1]
    return out


if __name__ == "__main__":
    key = jax.random.PRNGKey(0)
    k1, k2, k3, k4, k5 = jax.random.split(key, 5)

    # 1) Small demo shape consistent with nn.Upsample(mode='linear') on (N, C, L);
    #    force_pallas exercises the kernel (with L_out padded to 128 lanes).
    N, C, L = 2, 4, 16
    x_small = jax.random.normal(k1, (N, C, L), dtype=jnp.float32)
    y_small = jax.block_until_ready(upsample_linear(x_small, 2, force_pallas=True))
    np.testing.assert_allclose(
        np.asarray(y_small, dtype=np.float32),
        _reference_upsample_linear(np.asarray(x_small), 2),
        rtol=1e-5, atol=1e-5)

    # 2) Larger shape exercising the tiled / pipelined multi-step grid path
    #    (nc=2048 rows -> 4 grid steps, lane-dense 256-wide output).
    N2, C2, L2 = 8, 256, 128
    x_big = jax.random.normal(k2, (N2, C2, L2), dtype=jnp.float32)
    y_big = jax.block_until_ready(upsample_linear(x_big, 2))
    np.testing.assert_allclose(
        np.asarray(y_big, dtype=np.float32),
        _reference_upsample_linear(np.asarray(x_big), 2),
        rtol=1e-5, atol=1e-5)

    # 3) Row count not divisible by the tile -> partial last block.
    N3, C3, L3 = 3, 400, 128
    x_odd = jax.random.normal(k3, (N3, C3, L3), dtype=jnp.float32)
    y_odd = jax.block_until_ready(upsample_linear(x_odd, 2))
    np.testing.assert_allclose(
        np.asarray(y_odd, dtype=np.float32),
        _reference_upsample_linear(np.asarray(x_odd), 2),
        rtol=1e-5, atol=1e-5)

    # 4) L_out not a multiple of 128 -> padded lane-dense stores + wrapper slice.
    N4, C4, L4 = 2, 64, 80          # l_out = 160 -> padded to 256
    x_pad = jax.random.normal(k4, (N4, C4, L4), dtype=jnp.float32)
    y_pad = jax.block_until_ready(upsample_linear(x_pad, 2, force_pallas=True))
    np.testing.assert_allclose(
        np.asarray(y_pad, dtype=np.float32),
        _reference_upsample_linear(np.asarray(x_pad), 2),
        rtol=1e-5, atol=1e-5)

    # 5) bf16 path: sublane-packing-aware TM (multiple of 16), bf16 W (exact weights).
    N5, C5, L5 = 4, 64, 256
    x_bf = jax.random.normal(k5, (N5, C5, L5), dtype=jnp.bfloat16)
    y_bf = jax.block_until_ready(upsample_linear(x_bf, 2))
    np.testing.assert_allclose(
        np.asarray(y_bf, dtype=np.float32),
        _reference_upsample_linear(np.asarray(x_bf, dtype=np.float32), 2),
        rtol=1e-2, atol=1e-2)

    print("KERNEL_OK")
</pallas_src>

<mosaic_0001>
module attributes {stable_mosaic.version = 11 : i64} {
  func.func @_upsample_matmul_kernel(%arg0: i32, %arg1: memref<8x16xf32, #tpu.memory_space<vmem>>, %arg2: memref<16x128xf32, #tpu.memory_space<vmem>>, %arg3: memref<8x128xf32, #tpu.memory_space<vmem>>) attributes {dimension_semantics = [#tpu.dimension_semantics<parallel>], iteration_bounds = array<i64: 1>, scalar_prefetch = 0 : i64, scratch_operands = 0 : i64, tpu.core_type = #tpu.core_type<tc>, window_params = [{transform_indices = @transform_0, window_bounds = array<i64: 8, 16>}, {pipeline_mode = #tpu.pipeline_mode<synchronous>, transform_indices = @transform_1, window_bounds = array<i64: 16, 128>}, {transform_indices = @transform_2, window_bounds = array<i64: 8, 128>}]} {
    %c0 = arith.constant 0 : index
    %c0_0 = arith.constant 0 : index
    %0 = vector.load %arg1[%c0, %c0_0] : memref<8x16xf32, #tpu.memory_space<vmem>>, vector<8x16xf32>
    %c0_1 = arith.constant 0 : index
    %c0_2 = arith.constant 0 : index
    %1 = vector.load %arg2[%c0_1, %c0_2] : memref<16x128xf32, #tpu.memory_space<vmem>>, vector<16x128xf32>
    %cst = arith.constant dense<0.000000e+00> : vector<8x128xf32>
    %2 = tpu.matmul %0, %1, %cst {dimension_numbers = #tpu.dot_dimension_numbers<[1], [0], [0], [1], [0, 0, 1, 1], [], []>} : vector<8x16xf32>, vector<16x128xf32>, vector<8x128xf32> -> vector<8x128xf32>
    %c0_3 = arith.constant 0 : index
    %c0_4 = arith.constant 0 : index
    %3 = vector.load %arg3[%c0_3, %c0_4] : memref<8x128xf32, #tpu.memory_space<vmem>>, vector<8x128xf32>
    tpu.vector_store %arg3[%c0_3, %c0_4], %2 {strides = array<i32>} : memref<8x128xf32, #tpu.memory_space<vmem>>, vector<8x128xf32>,
    return
  }
  func.func @transform_0(%arg0: i32) -> (i32, i32) {
    %c0_i32 = arith.constant 0 : i32
    %c0_i32_0 = arith.constant 0 : i32
    return %arg0, %c0_i32 : i32, i32
  }
  func.func @transform_1(%arg0: i32) -> (i32, i32) {
    %c0_i32 = arith.constant 0 : i32
    %c0_i32_0 = arith.constant 0 : i32
    %c0_i32_1 = arith.constant 0 : i32
    return %c0_i32, %c0_i32_0 : i32, i32
  }
  func.func @transform_2(%arg0: i32) -> (i32, i32) {
    %c0_i32 = arith.constant 0 : i32
    %c0_i32_0 = arith.constant 0 : i32
    return %arg0, %c0_i32 : i32, i32
  }
}

module attributes {stable_mosaic.version = 11 : i64} {
  func.func @_upsample_matmul_kernel(%arg0: i32, %arg1: memref<8x16xf32, #tpu.memory_space<vmem>>, %arg2: memref<16x128xf32, #tpu.memory_space<vmem>>, %arg3: memref<8x128xf32, #tpu.memory_space<vmem>>) attributes {dimension_semantics = [#tpu.dimension_semantics<parallel>], iteration_bounds = array<i64: 1>, scalar_prefetch = 0 : i64, scratch_operands = 0 : i64, tpu.core_type = #tpu.core_type<tc>, window_params = [{transform_indices = @transform_0, window_bounds = array<i64: 8, 16>}, {pipeline_mode = #tpu.pipeline_mode<synchronous>, transform_indices = @transform_1, window_bounds = array<i64: 16, 128>}, {transform_indices = @transform_2, window_bounds = array<i64: 8, 128>}]} {
    %c0 = arith.constant 0 : index
    %c0_0 = arith.constant 0 : index
    %0 = vector.load %arg1[%c0, %c0_0] : memref<8x16xf32, #tpu.memory_space<vmem>>, vector<8x16xf32>
    %c0_1 = arith.constant 0 : index
    %c0_2 = arith.constant 0 : index
    %1 = vector.load %arg2[%c0_1, %c0_2] : memref<16x128xf32, #tpu.memory_space<vmem>>, vector<16x128xf32>
    %cst = arith.constant dense<0.000000e+00> : vector<8x128xf32>
    %2 = tpu.matmul %0, %1, %cst {dimension_numbers = #tpu.dot_dimension_numbers<[1], [0], [0], [1], [0, 0, 1, 1], [], []>} : vector<8x16xf32>, vector<16x128xf32>, vector<8x128xf32> -> vector<8x128xf32>
    %c0_3 = arith.constant 0 : index
    %c0_4 = arith.constant 0 : index
    %3 = vector.load %arg3[%c0_3, %c0_4] : memref<8x128xf32, #tpu.memory_space<vmem>>, vector<8x128xf32>
    tpu.vector_store %arg3[%c0_3, %c0_4], %2 {strides = array<i32>} : memref<8x128xf32, #tpu.memory_space<vmem>>, vector<8x128xf32>,
    return
  }
  func.func @transform_0(%arg0: i32) -> (i32, i32) {
    %c0_i32 = arith.constant 0 : i32
    %c0_i32_0 = arith.constant 0 : i32
    return %arg0, %c0_i32 : i32, i32
  }
  func.func @transform_1(%arg0: i32) -> (i32, i32) {
    %c0_i32 = arith.constant 0 : i32
    %c0_i32_0 = arith.constant 0 : i32
    %c0_i32_1 = arith.constant 0 : i32
    return %c0_i32, %c0_i32_0 : i32, i32
  }
  func.func @transform_2(%arg0: i32) -> (i32, i32) {
    %c0_i32 = arith.constant 0 : i32
    %c0_i32_0 = arith.constant 0 : i32
    return %arg0, %c0_i32 : i32, i32
  }
}

</mosaic_0001>

<bundles_post_ra>
// kernel: tpu_custom_call.1
= control target key start
LH: loop header
LB: loop body
LE: loop exit
PB: predicated region body
PF: predicated region fallthrough
CT: control target
= control target key end

     0   :  { %7 = vsyncpa [#allocation3], 0  ;;  %s247_s0 = inlined_call_operand.hbm [shape: f32[8,16], index: 0, kind: input, shape index: {}]   ;;  %s248_s1 = inlined_call_operand.hbm [shape: f32[16,128], index: 1, kind: input, shape index: {}]   ;;  %s249_s2 = inlined_call_operand.hbm [shape: f32[8,128], index: 2, kind: output, shape index: {}]  }
   0x1   :  { %8 = vsyncpa [#allocation6], 0 }
   0x2   :  { %9 = vsyncpa [#allocation4], 0  ;;  %s216_s9 = smov [#allocation2]   ;;  %s217_s11 = smov [#allocation5]  }
   0x3   :  { %s16_s10 = sshll.u32 %s216_s9, 4  ;;  %s25_s12 = sshll.u32 %s217_s11, 4  ;;  %s17_s10 = int_to_ptr.vmem [resolvable:$true] %s16_s10  ;;  %s26_s12 = int_to_ptr.vmem [resolvable:$true] %s25_s12 }
   0x4   :  { %s158_s13 = scalar_lea.vmem %s17_s10, 128  ;;  %p163_p1 = scmp.lt.s32.totalorder %s17_s10, %s17_s10 }
   0x5   :  { %p159_p0 = scmp.ne.s32.totalorder %s17_s10, %s158_s13  ;;  %p164_p2 = scmp.lt.s32.totalorder %s158_s13, %s158_s13 }
   0x7   :  { %p165_p3 = por %p164_p2, %p163_p1 }
   0x9   :  { %p166_p4 = pnand %p165_p3, %p159_p0 }
   0xb   :  { %169 = shalt.err (!%p166_p4)
}
   0xc   :  { %19 = dma.hbm_to_vmem [thread:$0]  %s247_s0, 128, %s17_s10, [#allocation3]  }
   0xd   :  { %s178_s16 = scalar_lea.vmem %s26_s12, 256  ;;  %p183_p6 = scmp.lt.s32.totalorder %s26_s12, %s26_s12 }
   0xe   :  { %p179_p5 = scmp.ne.s32.totalorder %s26_s12, %s178_s16  ;;  %p184_p7 = scmp.lt.s32.totalorder %s178_s16, %s178_s16 }
  0x10   :  { %p185_p8 = por %p184_p7, %p183_p6 }
  0x12   :  { %p186_p9 = pnand %p185_p8, %p179_p5 }
  0x14   :  { %189 = shalt.err (!%p186_p9)
}
  0x15   :  { %s218_s17 = smov 128   ;;  %s219_s18 = smov 8  }
  0x16   :  { %31 = dma.hbm_to_vmem [thread:$0]  %s248_s1, 256, %s26_s12, [#allocation6], %s218_s17, %s218_s17, %s219_s18  }
  0x17   :  { %210 = dma.done.wait [#allocation3], 128  }
  0x18   :  { %211 = vsyncadd [#allocation3], 4294967168 }
  0x19   :  { %212 = dma.done.wait [#allocation6], 256  }
  0x1a   :  { %213 = vsyncadd [#allocation6], 4294967040  ;;  %v220_v0 = vmov 0.0   ;;  %vm221_vm0 = vmmov 0   ;;  %v40_v1 = vld [vmem:[#allocation5 + $0x8] sm:$0xff]  ;;  %v39_v2 = vld [vmem:[#allocation5] sm:$0xff] }
  0x1b   :  { %136 = vmatprep.subr.mxu0 %v220_v0  ;;  %140 = vmatprep.mubr.msk.f32.mxu0 %vm221_vm0, %v220_v0  ;;  %v38_v3 = vld [vmem:[#allocation2] sm:$0xff]  ;;  %vm41_vm1 = vcmask 130048   ;;  %s222_s0 = smov [#allocation7]  }
  0x1c   :  { %137 = vmatpush3.msra.mxu0 %v40_v1  ;;  %s122_s21 = sshll.u32 %s222_s0, 4  ;;  %s123_s21 = int_to_ptr.vmem [resolvable:$true] %s122_s21 }
  0x1d   :  { %138 = vmatprep.subr.mxu0 %v220_v0  ;;  %s190_s1 = scalar_lea.vmem %s123_s21, 128  ;;  %p195_p11 = scmp.lt.s32.totalorder %s123_s21, %s123_s21 }
  0x1e   :  { %139 = vmatpush3.msra.mxu0 %v39_v2  ;;  %p191_p10 = scmp.ne.s32.totalorder %s123_s21, %s190_s1  ;;  %p196_p12 = scmp.lt.s32.totalorder %s190_s1, %s190_s1 }
  0x1f   :  { %141 = vmatmul.mubr.msk.f32.vlgmr.msra.gmra.mxu0 %vm41_vm1, %v38_v3 }
  0x20   :  { %p197_p13 = por %p196_p12, %p195_p11 }
  0x22   :  { %p198_p0 = pnand %p197_p13, %p191_p10 }
  0xdf   :  { %v111_v4 = vpop.f32.mrf.mxu0 }
  0xe0   :  { %115 = vst [vmem:[#allocation7] sm:$0xff] %v111_v4 }
  0xe1   :  { %v142_v5 = vpop.f32.mrf.mxu0 }
  0xe2   :  { %201 = shalt.err (!%p198_p0)
}
  0xe3   :  { %125 = dma.vmem_to_hbm [thread:$0]  %s123_s21, 128, %s249_s2, [#allocation4]  }
  0xe4   :  { %214 = dma.done.wait [#allocation4], 128  }
  0xe5   :  { %215 = vsyncadd [#allocation4], 4294967168 }
  0xe6   :  { %129 = vsyncpa [#allocation3], 1 }
  0xe7   :  { %130 = vsyncpa [#allocation6], 1 }
  0xe8   :  { %131 = vsyncpa [#allocation4], 1 }

// kernel: tpu_custom_call.1
= control target key start
LH: loop header
LB: loop body
LE: loop exit
PB: predicated region body
PF: predicated region fallthrough
CT: control target
= control target key end

     0   :  { %7 = vsyncpa [#allocation3], 0  ;;  %s247_s0 = inlined_call_operand.hbm [shape: f32[8,16], index: 0, kind: input, shape index: {}]   ;;  %s248_s1 = inlined_call_operand.hbm [shape: f32[16,128], index: 1, kind: input, shape index: {}]   ;;  %s249_s2 = inlined_call_operand.hbm [shape: f32[8,128], index: 2, kind: output, shape index: {}]  }
   0x1   :  { %8 = vsyncpa [#allocation6], 0 }
   0x2   :  { %9 = vsyncpa [#allocation4], 0  ;;  %s216_s9 = smov [#allocation2]   ;;  %s217_s11 = smov [#allocation5]  }
   0x3   :  { %s16_s10 = sshll.u32 %s216_s9, 4  ;;  %s25_s12 = sshll.u32 %s217_s11, 4  ;;  %s17_s10 = int_to_ptr.vmem [resolvable:$true] %s16_s10  ;;  %s26_s12 = int_to_ptr.vmem [resolvable:$true] %s25_s12 }
   0x4   :  { %s158_s13 = scalar_lea.vmem %s17_s10, 128  ;;  %p163_p1 = scmp.lt.s32.totalorder %s17_s10, %s17_s10 }
   0x5   :  { %p159_p0 = scmp.ne.s32.totalorder %s17_s10, %s158_s13  ;;  %p164_p2 = scmp.lt.s32.totalorder %s158_s13, %s158_s13 }
   0x7   :  { %p165_p3 = por %p164_p2, %p163_p1 }
   0x9   :  { %p166_p4 = pnand %p165_p3, %p159_p0 }
   0xb   :  { %169 = shalt.err (!%p166_p4)
}
   0xc   :  { %19 = dma.hbm_to_vmem [thread:$0]  %s247_s0, 128, %s17_s10, [#allocation3]  }
   0xd   :  { %s178_s16 = scalar_lea.vmem %s26_s12, 256  ;;  %p183_p6 = scmp.lt.s32.totalorder %s26_s12, %s26_s12 }
   0xe   :  { %p179_p5 = scmp.ne.s32.totalorder %s26_s12, %s178_s16  ;;  %p184_p7 = scmp.lt.s32.totalorder %s178_s16, %s178_s16 }
  0x10   :  { %p185_p8 = por %p184_p7, %p183_p6 }
  0x12   :  { %p186_p9 = pnand %p185_p8, %p179_p5 }
  0x14   :  { %189 = shalt.err (!%p186_p9)
}
  0x15   :  { %s218_s17 = smov 128   ;;  %s219_s18 = smov 8  }
  0x16   :  { %31 = dma.hbm_to_vmem [thread:$0]  %s248_s1, 256, %s26_s12, [#allocation6], %s218_s17, %s218_s17, %s219_s18  }
  0x17   :  { %210 = dma.done.wait [#allocation3], 128  }
  0x18   :  { %211 = vsyncadd [#allocation3], 4294967168 }
  0x19   :  { %212 = dma.done.wait [#allocation6], 256  }
  0x1a   :  { %213 = vsyncadd [#allocation6], 4294967040  ;;  %v220_v0 = vmov 0.0   ;;  %vm221_vm0 = vmmov 0   ;;  %v40_v1 = vld [vmem:[#allocation5 + $0x8] sm:$0xff]  ;;  %v39_v2 = vld [vmem:[#allocation5] sm:$0xff] }
  0x1b   :  { %136 = vmatprep.subr.mxu0 %v220_v0  ;;  %140 = vmatprep.mubr.msk.f32.mxu0 %vm221_vm0, %v220_v0  ;;  %v38_v3 = vld [vmem:[#allocation2] sm:$0xff]  ;;  %vm41_vm1 = vcmask 130048   ;;  %s222_s0 = smov [#allocation7]  }
  0x1c   :  { %137 = vmatpush3.msra.mxu0 %v40_v1  ;;  %s122_s21 = sshll.u32 %s222_s0, 4  ;;  %s123_s21 = int_to_ptr.vmem [resolvable:$true] %s122_s21 }
  0x1d   :  { %138 = vmatprep.subr.mxu0 %v220_v0  ;;  %s190_s1 = scalar_lea.vmem %s123_s21, 128  ;;  %p195_p11 = scmp.lt.s32.totalorder %s123_s21, %s123_s21 }
  0x1e   :  { %139 = vmatpush3.msra.mxu0 %v39_v2  ;;  %p191_p10 = scmp.ne.s32.totalorder %s123_s21, %s190_s1  ;;  %p196_p12 = scmp.lt.s32.totalorder %s190_s1, %s190_s1 }
  0x1f   :  { %141 = vmatmul.mubr.msk.f32.vlgmr.msra.gmra.mxu0 %vm41_vm1, %v38_v3 }
  0x20   :  { %p197_p13 = por %p196_p12, %p195_p11 }
  0x22   :  { %p198_p0 = pnand %p197_p13, %p191_p10 }
  0xdf   :  { %v111_v4 = vpop.f32.mrf.mxu0 }
  0xe0   :  { %115 = vst [vmem:[#allocation7] sm:$0xff] %v111_v4 }
  0xe1   :  { %v142_v5 = vpop.f32.mrf.mxu0 }
  0xe2   :  { %201 = shalt.err (!%p198_p0)
}
  0xe3   :  { %125 = dma.vmem_to_hbm [thread:$0]  %s123_s21, 128, %s249_s2, [#allocation4]  }
  0xe4   :  { %214 = dma.done.wait [#allocation4], 128  }
  0xe5   :  { %215 = vsyncadd [#allocation4], 4294967168 }
  0xe6   :  { %129 = vsyncpa [#allocation3], 1 }
  0xe7   :  { %130 = vsyncpa [#allocation6], 1 }
  0xe8   :  { %131 = vsyncpa [#allocation4], 1 }

</bundles_post_ra>
